<compile_context>
chip_gen: v7x
topology: tpu7x:2x2x1
jax: 0.10.0
libtpu: 0.0.40
codegen_flags: <defaults>
</compile_context>

<pallas_src>
import functools
import math

import jax
import jax.numpy as jnp
from jax import lax
from jax.experimental import pallas as pl
from jax.experimental.pallas import tpu as pltpu


# ---------------------------------------------------------------------------
# Kernel 1: per-(batch, head) QKV projection.
# ---------------------------------------------------------------------------
def _qkv_proj_kernel(x_ref, wq_ref, bq_ref, wk_ref, bk_ref, wv_ref, bv_ref,
                     q_ref, k_ref, v_ref, *, scale):
    x = x_ref[0].astype(jnp.bfloat16)                       # (T, C)

    q = jnp.dot(x, wq_ref[0], preferred_element_type=jnp.float32) + bq_ref[0]
    k = jnp.dot(x, wk_ref[0], preferred_element_type=jnp.float32) + bk_ref[0]
    v = jnp.dot(x, wv_ref[0], preferred_element_type=jnp.float32) + bv_ref[0]

    # Fold the 1/sqrt(hd) attention scale into q (cheap (T, hd) multiply).
    q_ref[0, 0] = (q * scale).astype(q_ref.dtype)
    k_ref[0, 0] = k.astype(k_ref.dtype)
    v_ref[0, 0] = v.astype(v_ref.dtype)


# ---------------------------------------------------------------------------
# Kernel 2: flash attention (online softmax over kv tiles) + output projection
#           accumulated across the head grid axis.
# ---------------------------------------------------------------------------
def _attn_proj_kernel(q_ref, k_ref, v_ref, wp_ref, bp_ref, o_ref,
                      m_scr, l_scr, acc_scr, out_scr, *, seq_tile):
    qi = pl.program_id(1)
    h = pl.program_id(2)
    kv = pl.program_id(3)
    n_h = pl.num_programs(2)
    n_kv = pl.num_programs(3)

    neg_big = -1e30  # finite "minus infinity" (robust if masks are extended)

    @pl.when(jnp.logical_and(h == 0, kv == 0))
    def _():
        out_scr[...] = jnp.zeros_like(out_scr)

    @pl.when(kv == 0)
    def _():
        m_scr[...] = jnp.full_like(m_scr, neg_big)
        l_scr[...] = jnp.zeros_like(l_scr)
        acc_scr[...] = jnp.zeros_like(acc_scr)

    # Causal block skip: kv tiles strictly above the diagonal do nothing.
    @pl.when(kv <= qi)
    def _():
        q = q_ref[0, 0]                                      # (TQ, hd) bf16 (pre-scaled)
        k = k_ref[0, 0]                                      # (TK, hd) bf16
        v = v_ref[0, 0]                                      # (TK, hd) bf16

        # q @ k^T without materializing a transpose of k.
        s = lax.dot_general(q, k, (((1,), (1,)), ((), ())),
                            preferred_element_type=jnp.float32)   # (TQ, TK) f32

        row = qi * seq_tile + lax.broadcasted_iota(jnp.int32, s.shape, 0)
        col = kv * seq_tile + lax.broadcasted_iota(jnp.int32, s.shape, 1)
        s = jnp.where(row >= col, s, neg_big)

        m_prev = m_scr[...]
        m_next = jnp.maximum(m_prev, jnp.max(s, axis=-1, keepdims=True))
        alpha = jnp.exp(m_prev - m_next)
        p = jnp.exp(s - m_next)                              # f32 softmax math

        l_scr[...] = alpha * l_scr[...] + jnp.sum(p, axis=-1, keepdims=True)
        acc_scr[...] = alpha * acc_scr[...] + jnp.dot(
            p.astype(jnp.bfloat16), v, preferred_element_type=jnp.float32)
        m_scr[...] = m_next

    # Per-head epilogue: normalize and fold this head into the output proj.
    @pl.when(kv == n_kv - 1)
    def _():
        y_h = acc_scr[...] * pl.reciprocal(l_scr[...], approx=True)   # (TQ, hd)
        out_scr[...] += jnp.dot(y_h.astype(jnp.bfloat16), wp_ref[0],
                                preferred_element_type=jnp.float32)

    @pl.when(jnp.logical_and(h == n_h - 1, kv == n_kv - 1))
    def _():
        o_ref[0] = (out_scr[...] + bp_ref[...]).astype(o_ref.dtype)


# ---------------------------------------------------------------------------
# Wrapper
# ---------------------------------------------------------------------------
def _prep_params(params, n_head):
    """Split (in, out) projection weights into head-major bf16 slabs."""
    C = params["wq"].shape[0]
    hd = C // n_head

    def split_cols_w(w):   # (C, C) -> (H, C, hd): columns of head h
        return jnp.transpose(w.reshape(C, n_head, hd), (1, 0, 2)).astype(jnp.bfloat16)

    def split_cols_b(b):   # (C,) -> (H, 1, hd)
        return b.reshape(n_head, 1, hd).astype(jnp.float32)

    return {
        "wq": split_cols_w(params["wq"]), "bq": split_cols_b(params["bq"]),
        "wk": split_cols_w(params["wk"]), "bk": split_cols_b(params["bk"]),
        "wv": split_cols_w(params["wv"]), "bv": split_cols_b(params["bv"]),
        # proj consumes y = [head0 | head1 | ...] -> split its rows per head
        "wp": params["wp"].reshape(n_head, hd, C).astype(jnp.bfloat16),
        "bp": params["bp"].reshape(1, C).astype(jnp.float32),
    }


def causal_self_attention(x, params, n_head, *, seq_tile=128):
    """x: (B, T, C) float32; params: dict of (in,out) weights and (C,) biases."""
    B, T, C = x.shape
    assert C % n_head == 0
    hd = C // n_head
    p = _prep_params(params, n_head)

    ts = min(seq_tile, T)                 # q tile == kv tile
    assert T % ts == 0, "T must be divisible by the sequence tile"
    n_q = n_kv = T // ts

    # ---- Kernel 1: QKV projection, grid (B, H) ------------------------------
    w_spec = pl.BlockSpec((1, C, hd), lambda b, h: (h, 0, 0))
    b_spec = pl.BlockSpec((1, 1, hd), lambda b, h: (h, 0, 0))
    x_spec = pl.BlockSpec((1, T, C), lambda b, h: (b, 0, 0))
    qkv_spec = pl.BlockSpec((1, 1, T, hd), lambda b, h: (b, h, 0, 0))
    qkv_shape = jax.ShapeDtypeStruct((B, n_head, T, hd), jnp.bfloat16)

    q, k, v = pl.pallas_call(
        functools.partial(_qkv_proj_kernel, scale=1.0 / math.sqrt(hd)),
        out_shape=(qkv_shape, qkv_shape, qkv_shape),
        grid_spec=pltpu.PrefetchScalarGridSpec(
            num_scalar_prefetch=0,
            grid=(B, n_head),
            in_specs=[x_spec,
                      w_spec, b_spec,     # query
                      w_spec, b_spec,     # key
                      w_spec, b_spec],    # value
            out_specs=(qkv_spec, qkv_spec, qkv_spec),
        ),
        compiler_params=pltpu.CompilerParams(
            dimension_semantics=("parallel", "parallel"),
            vmem_limit_bytes=64 * 1024 * 1024),
    )(x, p["wq"], p["bq"], p["wk"], p["bk"], p["wv"], p["bv"])

    # ---- Kernel 2: flash attention + output proj, grid (B, NQ, H, NKV) ------
    q_spec = pl.BlockSpec((1, 1, ts, hd), lambda b, qi, h, kv: (b, h, qi, 0))
    # Clamp the kv block index above the causal diagonal so skipped steps
    # don't trigger a fresh K/V DMA.
    kv_spec = pl.BlockSpec(
        (1, 1, ts, hd),
        lambda b, qi, h, kv: (b, h, jnp.where(kv <= qi, kv, qi), 0))
    wp_spec = pl.BlockSpec((1, hd, C), lambda b, qi, h, kv: (h, 0, 0))
    bp_spec = pl.BlockSpec((1, C), lambda b, qi, h, kv: (0, 0))
    o_spec = pl.BlockSpec((1, ts, C), lambda b, qi, h, kv: (b, qi, 0))

    return pl.pallas_call(
        functools.partial(_attn_proj_kernel, seq_tile=ts),
        out_shape=jax.ShapeDtypeStruct((B, T, C), x.dtype),
        grid_spec=pltpu.PrefetchScalarGridSpec(
            num_scalar_prefetch=0,
            grid=(B, n_q, n_head, n_kv),
            in_specs=[q_spec, kv_spec, kv_spec, wp_spec, bp_spec],
            out_specs=o_spec,
            scratch_shapes=[
                pltpu.VMEM((ts, 1), jnp.float32),    # running max  m
                pltpu.VMEM((ts, 1), jnp.float32),    # running sum  l
                pltpu.VMEM((ts, hd), jnp.float32),   # per-head attention acc
                pltpu.VMEM((ts, C), jnp.float32),    # output-projection acc
            ],
        ),
        compiler_params=pltpu.CompilerParams(
            dimension_semantics=("parallel", "parallel", "arbitrary", "arbitrary"),
            vmem_limit_bytes=64 * 1024 * 1024),
    )(q, k, v, p["wp"], p["bp"])


# ---------------------------------------------------------------------------
# Pure-JAX reference (mirrors the PyTorch forward, eval mode, f32).
# ---------------------------------------------------------------------------
def reference_attention(x, params, n_head):
    B, T, C = x.shape
    hd = C // n_head
    q = x @ params["wq"] + params["bq"]
    k = x @ params["wk"] + params["bk"]
    v = x @ params["wv"] + params["bv"]
    q = q.reshape(B, T, n_head, hd).transpose(0, 2, 1, 3)
    k = k.reshape(B, T, n_head, hd).transpose(0, 2, 1, 3)
    v = v.reshape(B, T, n_head, hd).transpose(0, 2, 1, 3)
    att = jnp.einsum("bhqd,bhkd->bhqk", q, k) / math.sqrt(hd)
    mask = jnp.tril(jnp.ones((T, T), bool))
    att = jnp.where(mask[None, None], att, -jnp.inf)
    att = jax.nn.softmax(att, axis=-1)
    y = jnp.einsum("bhqk,bhkd->bhqd", att, v)
    y = y.transpose(0, 2, 1, 3).reshape(B, T, C)
    return y @ params["wp"] + params["bp"]


if __name__ == "__main__":
    # Small shapes consistent with the module's forward: (B, T, C)
    B, T, C, n_head = 2, 8, 32, 4

    key = jax.random.PRNGKey(0)
    keys = jax.random.split(key, 9)

    # Linear weights stored pre-transposed to (in, out).
    wscale = 1.0 / math.sqrt(C)
    params = {
        "wq": jax.random.normal(keys[0], (C, C), jnp.float32) * wscale,
        "bq": jax.random.normal(keys[1], (C,), jnp.float32) * 0.01,
        "wk": jax.random.normal(keys[2], (C, C), jnp.float32) * wscale,
        "bk": jax.random.normal(keys[3], (C,), jnp.float32) * 0.01,
        "wv": jax.random.normal(keys[4], (C, C), jnp.float32) * wscale,
        "bv": jax.random.normal(keys[5], (C,), jnp.float32) * 0.01,
        "wp": jax.random.normal(keys[6], (C, C), jnp.float32) * wscale,
        "bp": jax.random.normal(keys[7], (C,), jnp.float32) * 0.01,
    }
    x = jax.random.normal(keys[8], (B, T, C), jnp.float32)

    out = causal_self_attention(x, params, n_head)
    out = jax.block_until_ready(out)

    ref = reference_attention(x, params, n_head)
    assert out.shape == (B, T, C)
    assert bool(jnp.all(jnp.isfinite(out))), "non-finite output"
    # Kernel uses bf16 MXU operands (f32 accumulation) -> compare with a
    # scale-relative tolerance against the f32 reference.
    err = float(jnp.max(jnp.abs(out - ref)) / (jnp.max(jnp.abs(ref)) + 1e-6))
    assert err < 5e-2, f"mismatch vs reference: rel-to-scale err={err:.4f}"

    print("KERNEL_OK")
</pallas_src>

<mosaic_0001>
module attributes {stable_mosaic.version = 11 : i64} {
  func.func @_qkv_proj_kernel(%arg0: i32, %arg1: i32, %arg2: memref<1x8x32xf32, #tpu.memory_space<vmem>>, %arg3: memref<1x32x8xbf16, #tpu.memory_space<vmem>>, %arg4: memref<1x1x8xf32, #tpu.memory_space<vmem>>, %arg5: memref<1x32x8xbf16, #tpu.memory_space<vmem>>, %arg6: memref<1x1x8xf32, #tpu.memory_space<vmem>>, %arg7: memref<1x32x8xbf16, #tpu.memory_space<vmem>>, %arg8: memref<1x1x8xf32, #tpu.memory_space<vmem>>, %arg9: memref<1x1x8x8xbf16, #tpu.memory_space<vmem>>, %arg10: memref<1x1x8x8xbf16, #tpu.memory_space<vmem>>, %arg11: memref<1x1x8x8xbf16, #tpu.memory_space<vmem>>) attributes {dimension_semantics = [#tpu.dimension_semantics<parallel>, #tpu.dimension_semantics<parallel>], iteration_bounds = array<i64: 2, 4>, scalar_prefetch = 0 : i64, scratch_operands = 0 : i64, tpu.core_type = #tpu.core_type<tc>, window_params = [{transform_indices = @transform_0, window_bounds = array<i64: 1, 8, 32>}, {transform_indices = @transform_1, window_bounds = array<i64: 1, 32, 8>}, {transform_indices = @transform_2, window_bounds = array<i64: 1, 1, 8>}, {transform_indices = @transform_3, window_bounds = array<i64: 1, 32, 8>}, {transform_indices = @transform_4, window_bounds = array<i64: 1, 1, 8>}, {transform_indices = @transform_5, window_bounds = array<i64: 1, 32, 8>}, {transform_indices = @transform_6, window_bounds = array<i64: 1, 1, 8>}, {transform_indices = @transform_7, window_bounds = array<i64: 1, 1, 8, 8>}, {transform_indices = @transform_8, window_bounds = array<i64: 1, 1, 8, 8>}, {transform_indices = @transform_9, window_bounds = array<i64: 1, 1, 8, 8>}]} {
    %c0 = arith.constant 0 : index
    %c0_0 = arith.constant 0 : index
    %c0_1 = arith.constant 0 : index
    %0 = vector.load %arg2[%c0, %c0_0, %c0_1] : memref<1x8x32xf32, #tpu.memory_space<vmem>>, vector<1x8x32xf32>
    %1 = vector.shape_cast %0 : vector<1x8x32xf32> to vector<8x32xf32>
    %2 = arith.truncf %1 : vector<8x32xf32> to vector<8x32xbf16>
    %c0_2 = arith.constant 0 : index
    %c0_3 = arith.constant 0 : index
    %c0_4 = arith.constant 0 : index
    %3 = vector.load %arg3[%c0_2, %c0_3, %c0_4] : memref<1x32x8xbf16, #tpu.memory_space<vmem>>, vector<1x32x8xbf16>
    %4 = vector.shape_cast %3 : vector<1x32x8xbf16> to vector<32x8xbf16>
    %cst = arith.constant dense<0.000000e+00> : vector<8x8xf32>
    %5 = tpu.matmul %2, %4, %cst {dimension_numbers = #tpu.dot_dimension_numbers<[1], [0], [0], [1], [0, 0, 1, 1], [], []>} : vector<8x32xbf16>, vector<32x8xbf16>, vector<8x8xf32> -> vector<8x8xf32>
    %c0_5 = arith.constant 0 : index
    %c0_6 = arith.constant 0 : index
    %c0_7 = arith.constant 0 : index
    %6 = vector.load %arg4[%c0_5, %c0_6, %c0_7] : memref<1x1x8xf32, #tpu.memory_space<vmem>>, vector<1x1x8xf32>
    %7 = vector.shape_cast %6 : vector<1x1x8xf32> to vector<1x8xf32>
    %8 = vector.broadcast %7 : vector<1x8xf32> to vector<8x8xf32>
    %9 = arith.addf %5, %8 : vector<8x8xf32>
    %c0_8 = arith.constant 0 : index
    %c0_9 = arith.constant 0 : index
    %c0_10 = arith.constant 0 : index
    %10 = vector.load %arg5[%c0_8, %c0_9, %c0_10] : memref<1x32x8xbf16, #tpu.memory_space<vmem>>, vector<1x32x8xbf16>
    %11 = vector.shape_cast %10 : vector<1x32x8xbf16> to vector<32x8xbf16>
    %cst_11 = arith.constant dense<0.000000e+00> : vector<8x8xf32>
    %12 = tpu.matmul %2, %11, %cst_11 {dimension_numbers = #tpu.dot_dimension_numbers<[1], [0], [0], [1], [0, 0, 1, 1], [], []>} : vector<8x32xbf16>, vector<32x8xbf16>, vector<8x8xf32> -> vector<8x8xf32>
    %c0_12 = arith.constant 0 : index
    %c0_13 = arith.constant 0 : index
    %c0_14 = arith.constant 0 : index
    %13 = vector.load %arg6[%c0_12, %c0_13, %c0_14] : memref<1x1x8xf32, #tpu.memory_space<vmem>>, vector<1x1x8xf32>
    %14 = vector.shape_cast %13 : vector<1x1x8xf32> to vector<1x8xf32>
    %15 = vector.broadcast %14 : vector<1x8xf32> to vector<8x8xf32>
    %16 = arith.addf %12, %15 : vector<8x8xf32>
    %c0_15 = arith.constant 0 : index
    %c0_16 = arith.constant 0 : index
    %c0_17 = arith.constant 0 : index
    %17 = vector.load %arg7[%c0_15, %c0_16, %c0_17] : memref<1x32x8xbf16, #tpu.memory_space<vmem>>, vector<1x32x8xbf16>
    %18 = vector.shape_cast %17 : vector<1x32x8xbf16> to vector<32x8xbf16>
    %cst_18 = arith.constant dense<0.000000e+00> : vector<8x8xf32>
    %19 = tpu.matmul %2, %18, %cst_18 {dimension_numbers = #tpu.dot_dimension_numbers<[1], [0], [0], [1], [0, 0, 1, 1], [], []>} : vector<8x32xbf16>, vector<32x8xbf16>, vector<8x8xf32> -> vector<8x8xf32>
    %c0_19 = arith.constant 0 : index
    %c0_20 = arith.constant 0 : index
    %c0_21 = arith.constant 0 : index
    %20 = vector.load %arg8[%c0_19, %c0_20, %c0_21] : memref<1x1x8xf32, #tpu.memory_space<vmem>>, vector<1x1x8xf32>
    %21 = vector.shape_cast %20 : vector<1x1x8xf32> to vector<1x8xf32>
    %22 = vector.broadcast %21 : vector<1x8xf32> to vector<8x8xf32>
    %23 = arith.addf %19, %22 : vector<8x8xf32>
    %cst_22 = arith.constant 0.353553385 : f32
    %24 = vector.broadcast %cst_22 : f32 to vector<8x8xf32>
    %25 = arith.mulf %9, %24 : vector<8x8xf32>
    %26 = arith.truncf %25 : vector<8x8xf32> to vector<8x8xbf16>
    %c0_23 = arith.constant 0 : index
    %c0_24 = arith.constant 0 : index
    %c0_25 = arith.constant 0 : index
    %c0_26 = arith.constant 0 : index
    %27 = vector.load %arg9[%c0_23, %c0_24, %c0_25, %c0_26] : memref<1x1x8x8xbf16, #tpu.memory_space<vmem>>, vector<1x1x8x8xbf16>
    %28 = vector.shape_cast %27 : vector<1x1x8x8xbf16> to vector<8x8xbf16>
    %29 = vector.shape_cast %26 : vector<8x8xbf16> to vector<1x1x8x8xbf16>
    tpu.vector_store %arg9[%c0_23, %c0_24, %c0_25, %c0_26], %29 {strides = array<i32>} : memref<1x1x8x8xbf16, #tpu.memory_space<vmem>>, vector<1x1x8x8xbf16>,
    %30 = arith.truncf %16 : vector<8x8xf32> to vector<8x8xbf16>
    %c0_27 = arith.constant 0 : index
    %c0_28 = arith.constant 0 : index
    %c0_29 = arith.constant 0 : index
    %c0_30 = arith.constant 0 : index
    %31 = vector.load %arg10[%c0_27, %c0_28, %c0_29, %c0_30] : memref<1x1x8x8xbf16, #tpu.memory_space<vmem>>, vector<1x1x8x8xbf16>
    %32 = vector.shape_cast %31 : vector<1x1x8x8xbf16> to vector<8x8xbf16>
    %33 = vector.shape_cast %30 : vector<8x8xbf16> to vector<1x1x8x8xbf16>
    tpu.vector_store %arg10[%c0_27, %c0_28, %c0_29, %c0_30], %33 {strides = array<i32>} : memref<1x1x8x8xbf16, #tpu.memory_space<vmem>>, vector<1x1x8x8xbf16>,
    %34 = arith.truncf %23 : vector<8x8xf32> to vector<8x8xbf16>
    %c0_31 = arith.constant 0 : index
    %c0_32 = arith.constant 0 : index
    %c0_33 = arith.constant 0 : index
    %c0_34 = arith.constant 0 : index
    %35 = vector.load %arg11[%c0_31, %c0_32, %c0_33, %c0_34] : memref<1x1x8x8xbf16, #tpu.memory_space<vmem>>, vector<1x1x8x8xbf16>
    %36 = vector.shape_cast %35 : vector<1x1x8x8xbf16> to vector<8x8xbf16>
    %37 = vector.shape_cast %34 : vector<8x8xbf16> to vector<1x1x8x8xbf16>
    tpu.vector_store %arg11[%c0_31, %c0_32, %c0_33, %c0_34], %37 {strides = array<i32>} : memref<1x1x8x8xbf16, #tpu.memory_space<vmem>>, vector<1x1x8x8xbf16>,
    return
  }
  func.func @transform_0(%arg0: i32, %arg1: i32) -> (i32, i32, i32) {
    %c0_i32 = arith.constant 0 : i32
    %c0_i32_0 = arith.constant 0 : i32
    %c0_i32_1 = arith.constant 0 : i32
    return %arg0, %c0_i32, %c0_i32_0 : i32, i32, i32
  }
  func.func @transform_1(%arg0: i32, %arg1: i32) -> (i32, i32, i32) {
    %c0_i32 = arith.constant 0 : i32
    %c0_i32_0 = arith.constant 0 : i32
    %c0_i32_1 = arith.constant 0 : i32
    return %arg1, %c0_i32, %c0_i32_0 : i32, i32, i32
  }
  func.func @transform_2(%arg0: i32, %arg1: i32) -> (i32, i32, i32) {
    %c0_i32 = arith.constant 0 : i32
    %c0_i32_0 = arith.constant 0 : i32
    %c0_i32_1 = arith.constant 0 : i32
    return %arg1, %c0_i32, %c0_i32_0 : i32, i32, i32
  }
  func.func @transform_3(%arg0: i32, %arg1: i32) -> (i32, i32, i32) {
    %c0_i32 = arith.constant 0 : i32
    %c0_i32_0 = arith.constant 0 : i32
    %c0_i32_1 = arith.constant 0 : i32
    return %arg1, %c0_i32, %c0_i32_0 : i32, i32, i32
  }
  func.func @transform_4(%arg0: i32, %arg1: i32) -> (i32, i32, i32) {
    %c0_i32 = arith.constant 0 : i32
    %c0_i32_0 = arith.constant 0 : i32
    %c0_i32_1 = arith.constant 0 : i32
    return %arg1, %c0_i32, %c0_i32_0 : i32, i32, i32
  }
  func.func @transform_5(%arg0: i32, %arg1: i32) -> (i32, i32, i32) {
    %c0_i32 = arith.constant 0 : i32
    %c0_i32_0 = arith.constant 0 : i32
    %c0_i32_1 = arith.constant 0 : i32
    return %arg1, %c0_i32, %c0_i32_0 : i32, i32, i32
  }
  func.func @transform_6(%arg0: i32, %arg1: i32) -> (i32, i32, i32) {
    %c0_i32 = arith.constant 0 : i32
    %c0_i32_0 = arith.constant 0 : i32
    %c0_i32_1 = arith.constant 0 : i32
    return %arg1, %c0_i32, %c0_i32_0 : i32, i32, i32
  }
  func.func @transform_7(%arg0: i32, %arg1: i32) -> (i32, i32, i32, i32) {
    %c0_i32 = arith.constant 0 : i32
    %c0_i32_0 = arith.constant 0 : i32
    %c0_i32_1 = arith.constant 0 : i32
    return %arg0, %arg1, %c0_i32, %c0_i32_0 : i32, i32, i32, i32
  }
  func.func @transform_8(%arg0: i32, %arg1: i32) -> (i32, i32, i32, i32) {
    %c0_i32 = arith.constant 0 : i32
    %c0_i32_0 = arith.constant 0 : i32
    %c0_i32_1 = arith.constant 0 : i32
    return %arg0, %arg1, %c0_i32, %c0_i32_0 : i32, i32, i32, i32
  }
  func.func @transform_9(%arg0: i32, %arg1: i32) -> (i32, i32, i32, i32) {
    %c0_i32 = arith.constant 0 : i32
    %c0_i32_0 = arith.constant 0 : i32
    %c0_i32_1 = arith.constant 0 : i32
    return %arg0, %arg1, %c0_i32, %c0_i32_0 : i32, i32, i32, i32
  }
}

</mosaic_0001>

<bundles_post_ra>
// kernel: tpu_custom_call.1
= control target key start
LH: loop header
LB: loop body
LE: loop exit
PB: predicated region body
PF: predicated region fallthrough
CT: control target
= control target key end

     0   :  { %s2493_s0 = inlined_call_operand.hbm [shape: f32[2,8,32], index: 0, kind: input, shape index: {}]   ;;  %s2494_s1 = inlined_call_operand.hbm [shape: bf16[4,32,8], index: 1, kind: input, shape index: {}]   ;;  %s2495_s2 = inlined_call_operand.hbm [shape: f32[4,1,8], index: 2, kind: input, shape index: {}]   ;;  %s2496_s3 = inlined_call_operand.hbm [shape: bf16[4,32,8], index: 3, kind: input, shape index: {}]   ;;  %s2497_s4 = inlined_call_operand.hbm [shape: f32[4,1,8], index: 4, kind: input, shape index: {}]   ;;  %s2498_s5 = inlined_call_operand.hbm [shape: bf16[4,32,8], index: 5, kind: input, shape index: {}]   ;;  %s2499_s6 = inlined_call_operand.hbm [shape: f32[4,1,8], index: 6, kind: input, shape index: {}]   ;;  %s2500_s7 = inlined_call_operand.hbm [shape: bf16[2,4,8,8], index: 7, kind: output, shape index: {0}]   ;;  %s2501_s8 = inlined_call_operand.hbm [shape: bf16[2,4,8,8], index: 8, kind: output, shape index: {1}]   ;;  %s2502_s9 = inlined_call_operand.hbm [shape: bf16[2,4,8,8], index: 9, kind: output, shape index: {2}]  }
   0x1   :  { %2534 = sst [smem:[#allocation39_spill]] %s2493_s0 }
   0x2   :  { %2535 = sst [smem:[#allocation40_spill]] %s2494_s1 }
   0x3   :  { %2536 = sst [smem:[#allocation41_spill]] %s2495_s2 }
   0x4   :  { %2537 = sst [smem:[#allocation42_spill]] %s2496_s3 }
   0x5   :  { %2538 = sst [smem:[#allocation43_spill]] %s2497_s4 }
   0x6   :  { %2539 = sst [smem:[#allocation44_spill]] %s2498_s5 }
   0x7   :  { %2540 = sst [smem:[#allocation45_spill]] %s2499_s6 }
   0x8   :  { %2541 = sst [smem:[#allocation46_spill]] %s2500_s7 }
   0x9   :  { %2542 = sst [smem:[#allocation47_spill]] %s2501_s8 }
   0xa   :  { %2543 = sst [smem:[#allocation48_spill]] %s2502_s9 }
   0xb   :  { %15 = vsyncpa [#allocation3], 0 }
   0xc   :  { %17 = vsyncpa [#allocation3 + $0x1], 0 }
   0xd   :  { %18 = vsyncpa [#allocation6], 0 }
   0xe   :  { %20 = vsyncpa [#allocation6 + $0x1], 0 }
   0xf   :  { %21 = vsyncpa [#allocation9], 0 }
  0x10   :  { %23 = vsyncpa [#allocation9 + $0x1], 0 }
  0x11   :  { %24 = vsyncpa [#allocation12], 0 }
  0x12   :  { %26 = vsyncpa [#allocation12 + $0x1], 0 }
  0x13   :  { %27 = vsyncpa [#allocation4], 0 }
  0x14   :  { %29 = vsyncpa [#allocation4 + $0x1], 0 }
  0x15   :  { %30 = vsyncpa [#allocation16], 0 }
  0x16   :  { %32 = vsyncpa [#allocation16 + $0x1], 0  ;;  %s1880_s30 = smov 0   ;;  %s1882_s10 = smov 0  }
  0x17   :  { %s1884_s11 = smov 0   ;;  %s1886_s12 = smov 0  }
  0x18   :  { %s1888_s13 = smov 0   ;;  %s1890_s14 = smov 0  }
  0x19   :  { %s1892_s15 = smov 0   ;;  %s1894_s16 = smov 0  }
  0x1a   :  { %s1896_s17 = smov 0   ;;  %s1898_s18 = smov 0  }
  0x1b   :  { %s1900_s19 = smov 0   ;;  %s1902_s20 = smov 0  }
  0x1c   :  { %s1904_s21 = smov 0   ;;  %s1906_s22 = smov 0  }
  0x1d LB: > { %2544 = sst [smem:[#allocation24_spill]] %s1770_s11  ;;  %p2511_p0 = scmp.eq.s32.totalorder %s1814_s22, 0  ;;  %s1814_s22 = sphi %s1906_s22, %s38_s22   ;;  %s1810_s21 = sphi %s1904_s21, %s2614_s21   ;;  %s1806_s20 = sphi %s1902_s20, %s2613_s20   ;;  %s1802_s19 = sphi %s1900_s19, %s2612_s19   ;;  %s1798_s18 = sphi %s1898_s18, %s2611_s18   ;;  %s1794_s17 = sphi %s1896_s17, %s2610_s17   ;;  %s1790_s16 = sphi %s1894_s16, %s2620_s16   ;;  %s1786_s15 = sphi %s1892_s15, %s2619_s15   ;;  %s1782_s14 = sphi %s1890_s14, %s2608_s14   ;;  %s1778_s13 = sphi %s1888_s13, %s2618_s13   ;;  %s1774_s12 = sphi %s1886_s12, %s2617_s12   ;;  %s1770_s11 = sphi %s1884_s11, %s2606_s11   ;;  %s1766_s10 = sphi %s1882_s10, %s2616_s10   ;;  %s1762_s30 = sphi %s1880_s30, %s2615_s30  }
  0x1e   : > { %2545 = sst [smem:[#allocation25_spill]] %s1782_s14  ;;  %p90_p1 = scmp.ne.s32.totalorder %s1782_s14, %s1778_s13 }
  0x1f   : > { %2546 = sst [smem:[#allocation26_spill]] %s1794_s17  ;;  %p2510_p2 = scmp.lt.s32.totalorder %s1814_s22, 8 }
  0x20   : > { %2547 = sst [smem:[#allocation27_spill]] %s1798_s18  ;;  %p92_p3 = por %p90_p1, %p2511_p0 }
  0x21   : > { %2548 = sst [smem:[#allocation28_spill]] %s1802_s19  ;;  %s1957_s23 = sand.u32 1, %s1814_s22  }
  0x22   : > { %2549 = sst [smem:[#allocation29_spill]] %s1806_s20  ;;  %s1960_s24 = sand.u32 1, %s1782_s14  }
  0x23   : > { %2550 = sst [smem:[#allocation30_spill]] %s1810_s21  ;;  %s1963_s25 = sshll.u32 %s1960_s24, 4 }
  0x24   : > { %2551 = sst [smem:[#allocation31_spill]] %s1960_s24  ;;  %s1966_s26 = sshll.u32 %s1806_s20, 8 }
  0x25   : > { %s2552_s1 = sld [smem:[#allocation40_spill]]  ;;  %s356_s9 = scalar_lea.vmem [#allocation5], %s1963_s25 }
  0x26   : > { %s363_s7 = sshll.u32 %s356_s9, 4  ;;  %p1977_p4 = pnand %p2510_p2, %p92_p3  ;;  %s1981_s7 = int_to_ptr.vmem [resolvable:$true] %s363_s7 }
  0x28   : > { %s2553_s8 = scalar_select %p1977_p4, 1, 0 }
  0x29   : > { %p1988_p6 = pneg %p1977_p4 }
  0x2b   : > { %s1972_s29 = scalar_lea.hbm %s2552_s1, %s1966_s26  ;;  %s1391_s6 = scalar_lea.hbm %s2552_s1, 1024 }
  0x2c   : > { %s1386_s19 = scalar_lea.hbm %s1972_s29, 256  ;;  %p1392_p9 = scmp.lt.u32.totalorder %s1972_s29, %s2552_s1 }
  0x2d   : > { %p1387_p5 = scmp.ne.s32.totalorder %s1972_s29, %s1386_s19  ;;  %p1393_p10 = scmp.lt.u32.totalorder %s1391_s6, %s1386_s19 }
  0x2e   : > { %p1395_p12 = scmp.lt.u32.totalorder %s1386_s19, %s1972_s29 }
  0x2f   : > { %p1389_p7 = pnand %p1988_p6, %p1387_p5  ;;  %p1394_p11 = por %p1393_p10, %p1392_p9 }
  0x31   : > { %p1390_p8 = pneg %p1389_p7  ;;  %p1396_p13 = por %p1395_p12, %p1394_p11 }
  0x33   : > { %p1397_p1 = pnand %p1396_p13, %p1390_p8 }
  0x35   : > { %1400 = shalt.err (!%p1397_p1)
}
  0x36   : > { %s1401_s18 = scalar_lea.vmem %s1981_s7, 256  ;;  %s1816_s9 = smov [#allocation5]  }
  0x37   : > { %p1402_p3 = scmp.ne.s32.totalorder %s1981_s7, %s1401_s18  ;;  %s1406_s28 = sshll.u32 %s1816_s9, 4  ;;  %s1407_s28 = int_to_ptr.vmem [resolvable:$false] %s1406_s28 }
  0x38   : > { %s1408_s4 = scalar_lea.vmem %s1407_s28, 512  ;;  %p1409_p2 = scmp.lt.s32.totalorder %s1981_s7, %s1407_s28 }
  0x39   : > { %p1404_p5 = pnand %p1402_p3, %p1988_p6  ;;  %p1410_p0 = scmp.lt.s32.totalorder %s1408_s4, %s1401_s18 }
  0x3b   : > { %p1405_p7 = pneg %p1404_p5  ;;  %p1411_p9 = por %p1410_p0, %p1409_p2 }
  0x3d   : > { %p1412_p10 = pnand %p1411_p9, %p1405_p7 }
  0x3f   : > { %1415 = shalt.err (!%p1412_p10)
}
  0x40   : > { %s2513_s6 = smov 64   ;;  %s2515_s19 = smov 4  }
  0x41   : > { %s2555_s18 = scalar_lea.sflag [#allocation6], %s1957_s23  ;;  %p1143_p0 = scmp.ge.s32.totalorder %s1814_s22, 1 }
  0x42   : > { %1236 = dma.hbm_to_vmem [thread:$0]  (!%p1977_p4), %s1972_s29, 256, %s1981_s7, %s2555_s18, %s2513_s6, %s2513_s6, %s2515_s19  }
  0x43   : > { %p464_p2 = scmp.lt.s32.totalorder %s1814_s22, 9  ;;  %s2558_s3 = sld [smem:[#allocation42_spill]] }
  0x44   : > { %s394_s1 = scalar_lea.vmem [#allocation8], %s1963_s25  ;;  %s2519_s7 = scalar_lea.sflag [#allocation9], %s1957_s23 }
  0x45   : > { %p2018_p8 = pnand %p1143_p0, %p464_p2  ;;  %s401_s2 = sshll.u32 %s394_s1, 4  ;;  %s2029_s2 = int_to_ptr.vmem [resolvable:$true] %s401_s2 }
  0x47   : > { %s2556_s24 = scalar_select %p2018_p8, 1, 0 }
  0x49   : > { %2557 = sst [smem:[#allocation32_spill]] %s2556_s24  ;;  %s2026_s4 = scalar_lea.hbm %s2558_s3, %s1966_s26 }
  0x4a   : > { %s1416_s29 = scalar_lea.hbm %s2026_s4, 256  ;;  %s1421_s9 = scalar_lea.hbm %s2558_s3, 1024 }
  0x4b   : > { %p1417_p11 = scmp.ne.s32.totalorder %s2026_s4, %s1416_s29  ;;  %p1422_p1 = scmp.lt.u32.totalorder %s2026_s4, %s2558_s3 }
  0x4c   : > { %p1423_p3 = scmp.lt.u32.totalorder %s1421_s9, %s1416_s29  ;;  %p1425_p7 = scmp.lt.u32.totalorder %s1416_s29, %s2026_s4 }
  0x4d   : > { %p1419_p12 = pnand %p1417_p11, %p1988_p6 }
  0x4e   : > { %p1424_p5 = por %p1423_p3, %p1422_p1 }
  0x4f   : > { %p1420_p13 = pneg %p1419_p12 }
  0x50   : > { %p1426_p9 = por %p1425_p7, %p1424_p5 }
  0x52   : > { %p1427_p10 = pnand %p1426_p9, %p1420_p13 }
  0x54   : > { %1430 = shalt.err (!%p1427_p10)
}
  0x55   : > { %s1431_s1 = scalar_lea.vmem %s2029_s2, 256  ;;  %s1819_s6 = smov [#allocation8]  }
  0x56   : > { %p1432_p0 = scmp.ne.s32.totalorder %s2029_s2, %s1431_s1  ;;  %s1436_s18 = sshll.u32 %s1819_s6, 4  ;;  %s1437_s18 = int_to_ptr.vmem [resolvable:$false] %s1436_s18 }
  0x57   : > { %s1438_s19 = scalar_lea.vmem %s1437_s18, 512  ;;  %p1439_p12 = scmp.lt.s32.totalorder %s2029_s2, %s1437_s18 }
  0x58   : > { %p1434_p2 = pnand %p1432_p0, %p1988_p6  ;;  %p1440_p8 = scmp.lt.s32.totalorder %s1438_s19, %s1431_s1 }
  0x5a   : > { %p1435_p11 = pneg %p1434_p2  ;;  %p1441_p1 = por %p1440_p8, %p1439_p12 }
  0x5c   : > { %p1442_p3 = pnand %p1441_p1, %p1435_p11 }
  0x5e   : > { %1445 = shalt.err (!%p1442_p3)
}
  0x5f   : > { %s2559_s29 = smov 4   ;;  %s2560_s9 = smov 64  }
  0x60   : > { %1242 = dma.hbm_to_vmem [thread:$0]  (!%p1977_p4), %s2026_s4, 256, %s2029_s2, %s2519_s7, %s2560_s9, %s2560_s9, %s2559_s29  }
  0x61   : > { %s2561_s5 = sld [smem:[#allocation44_spill]]  ;;  %s432_s18 = scalar_lea.vmem [#allocation11], %s1963_s25 }
  0x62   : > { %s439_s19 = sshll.u32 %s432_s18, 4  ;;  %s2518_s3 = scalar_lea.sflag [#allocation12], %s1957_s23  ;;  %s2065_s19 = int_to_ptr.vmem [resolvable:$true] %s439_s19 }
  0x67   : > { %s2062_s1 = scalar_lea.hbm %s2561_s5, %s1966_s26  ;;  %s1451_s28 = scalar_lea.hbm %s2561_s5, 1024 }
  0x68   : > { %s1446_s24 = scalar_lea.hbm %s2062_s1, 256  ;;  %p1452_p7 = scmp.lt.u32.totalorder %s2062_s1, %s2561_s5 }
  0x69   : > { %p1447_p8 = scmp.ne.s32.totalorder %s2062_s1, %s1446_s24  ;;  %p1453_p9 = scmp.lt.u32.totalorder %s1451_s28, %s1446_s24 }
  0x6a   : > { %p1455_p0 = scmp.lt.u32.totalorder %s1446_s24, %s2062_s1 }
  0x6b   : > { %p1449_p13 = pnand %p1447_p8, %p1988_p6  ;;  %p1454_p10 = por %p1453_p9, %p1452_p7 }
  0x6d   : > { %p1450_p5 = pneg %p1449_p13  ;;  %p1456_p2 = por %p1455_p0, %p1454_p10 }
  0x6f   : > { %p1457_p11 = pnand %p1456_p2, %p1450_p5 }
  0x71   : > { %1460 = shalt.err (!%p1457_p11)
}
  0x72   : > { %s1461_s25 = scalar_lea.vmem %s2065_s19, 256  ;;  %s1820_s18 = smov [#allocation11]  }
  0x73   : > { %p1462_p12 = scmp.ne.s32.totalorder %s2065_s19, %s1461_s25  ;;  %s1466_s2 = sshll.u32 %s1820_s18, 4  ;;  %s1467_s2 = int_to_ptr.vmem [resolvable:$false] %s1466_s2 }
  0x74   : > { %s1468_s4 = scalar_lea.vmem %s1467_s2, 512  ;;  %p1469_p8 = scmp.lt.s32.totalorder %s2065_s19, %s1467_s2 }
  0x75   : > { %p1464_p1 = pnand %p1462_p12, %p1988_p6  ;;  %p1470_p13 = scmp.lt.s32.totalorder %s1468_s4, %s1461_s25 }
  0x77   : > { %p1465_p3 = pneg %p1464_p1  ;;  %p1471_p7 = por %p1470_p13, %p1469_p8 }
  0x79   : > { %p1472_p9 = pnand %p1471_p7, %p1465_p3 }
  0x7b   : > { %1475 = shalt.err (!%p1472_p9)
}
  0x7c   : > { %1248 = dma.hbm_to_vmem [thread:$0]  (!%p1977_p4), %s2062_s1, 256, %s2065_s19, %s2518_s3, %s2560_s9, %s2560_s9, %s2559_s29  }
  0x7d   : > { %s2095_s24 = sadd.s32 4294967295, %s1814_s22   ;;  %s47_s26 = sadd.s32 1, %s1806_s20 }
  0x7e   : > { %p48_p5 = scmp.ge.s32.totalorder %s47_s26, 4  ;;  %s50_s6 = sadd.s32 1, %s1810_s21 }
  0x7f   : > { %s57_s25 = sadd.s32 1, %s1794_s17  ;;  %p64_p10 = scmp.ne.s32.totalorder %s1794_s17, %s1790_s16 }
  0x80   : > { %s2622_s26 = smov (%p48_p5, %s47_s26), 0  ;;  %s2624_s6 = smov (!%p48_p5, %s50_s6), %s1810_s21 }
  0x81   : > { %2562 = sst [smem:[#allocation33_spill]] %s2622_s26  ;;  %p2563_p0 = scmp.eq.s32.totalorder %s1814_s22, 0 }
  0x82   : > { %p70_p11 = scmp.ne.s32.totalorder %s1790_s16, %s1786_s15  ;;  %p52_p12 = scmp.ge.s32.totalorder %s2624_s6, 2 }
  0x83   : > { %p2108_p2 = por %p2563_p0, %p64_p10  ;;  %p71_p1 = scmp.eq.s32.totalorder %s2095_s24, 0 }
  0x84   : > { %s80_s9 = ssub.s32 %s1806_s20, %s2622_s26  ;;  %s83_s1 = sadd.s32 1, %s1782_s14 }
  0x85   : > { %s2626_s6 = smov (%p52_p12, %s2624_s6), 0  ;;  %p2120_p3 = por %p71_p1, %p70_p11 }
  0x86   : > { %2565 = sst [smem:[#allocation34_spill]] %s2626_s6  ;;  %p81_p8 = scmp.eq.s32.totalorder %s80_s9, 0 }
  0x87   : > { %s2566_s19 = scalar_select %p2120_p3, 1, 0 }
  0x88   : > { %s54_s15 = ssub.s32 %s1810_s21, %s2626_s6  ;;  %p96_p13 = scmp.ne.s32.totalorder %s1778_s13, %s1774_s12 }
  0x89   : > { %p55_p7 = scmp.eq.s32.totalorder %s54_s15, 0  ;;  %s238_s18 = sor.u32 %s80_s9, %s54_s15 }
  0x8a   : > { %s2129_s2 = scalar_select %p81_p8, %s1782_s14, %s83_s1  }
  0x8b   : > { %s2132_s4 = scalar_select %p55_p7, %s1794_s17, %s57_s25  }
  0x8c   : > { %2567 = sst [smem:[#allocation35_spill]] %s2129_s2  ;;  %p2134_p9 = por %p96_p13, %p71_p1 }
  0x8d   : > { %2568 = sst [smem:[#allocation36_spill]] %s2132_s4  ;;  %p239_p5 = scmp.eq.s32.totalorder %s238_s18, 0 }
  0x8e   : > { %s2569_s3 = scalar_select %p2134_p9, 1, 0 }
  0x8f   : > { %s241_s7 = sadd.s32 1, %s1770_s11  ;;  %p251_p10 = scmp.ne.s32.totalorder %s1770_s11, %s1766_s10 }
  0x90   : > { %s2142_s28 = scalar_select %p239_p5, %s1770_s11, %s241_s7  }
  0x91   : > { %p252_p0 = scmp.eq.s32.totalorder %s2095_s24, 7  ;;  %p257_p11 = scmp.ne.s32.totalorder %s1766_s10, %s1762_s30 }
  0x92   : > { %2570 = sst [smem:[#allocation37_spill]] %s2142_s28  ;;  %s2571_s12 = sadd.s32 4294967294, %s1814_s22  }
  0x93   : > { %p258_p12 = scmp.eq.s32.totalorder %s2571_s12, 7  ;;  %s334_s9 = sand.u32 1, %s1794_s17  }
  0x94   : > { %p2150_p8 = por %p252_p0, %p251_p10  ;;  %s1129_s15 = sshll.u32 %s334_s9, 3 }
  0x95   : > { %p2154_p1 = por %p258_p12, %p257_p11  ;;  %s1130_s18 = sshll.u32 %s1810_s21, 7 }
  0x96   : > { %s2572_s25 = scalar_select %p2150_p8, 1, 0 }
  0x97   : > { %s2573_s1 = scalar_select %p2154_p1, 1, 0 }
  0x98   : > { %s2575_s0 = sld [smem:[#allocation39_spill]]  ;;  %s338_s12 = scalar_lea.vmem [#allocation2], %s1129_s15 }
  0x99   : > { %2574 = sst [smem:[#allocation38_spill]] %s2573_s1  ;;  %s345_s26 = sshll.u32 %s338_s12, 4  ;;  %s2164_s26 = int_to_ptr.vmem [resolvable:$true] %s345_s26 }
  0x9a   : > { %p2576_p13 = scmp.lt.s32.totalorder %s1814_s22, 8  ;;  %s2175_s21 = sshll.u32 %s1806_s20, 4 }
  0x9b   : > { %s335_s15 = scalar_lea.sflag [#allocation3], %s334_s9 }
  0x9c   : > { %p2170_p7 = pnand %p2576_p13, %p2108_p2 }
  0x9e   : > { %s2162_s7 = scalar_lea.hbm %s2575_s0, %s1130_s18  ;;  %s2578_s18 = sld [smem:[#allocation41_spill]] }
  0x9f   : > { %s1476_s12 = scalar_lea.hbm %s2162_s7, 128  ;;  %p1478_p10 = pneg %p2170_p7 }
  0xa0   : > { %p1477_p5 = scmp.ne.s32.totalorder %s2162_s7, %s1476_s12  ;;  %s1481_s20 = scalar_lea.hbm %s2575_s0, 256 }
  0xa1   : > { %p1482_p11 = scmp.lt.u32.totalorder %s2162_s7, %s2575_s0  ;;  %p1483_p12 = scmp.lt.u32.totalorder %s1481_s20, %s1476_s12 }
  0xa2   : > { %p1479_p2 = pnand %p1478_p10, %p1477_p5  ;;  %p1485_p1 = scmp.lt.u32.totalorder %s1476_s12, %s2162_s7 }
  0xa3   : > { %p1484_p13 = por %p1483_p12, %p1482_p11 }
  0xa4   : > { %s2579_s2 = smov %s2578_s18  ;;  %s2181_s17 = scalar_lea.hbm %s2578_s18, %s2175_s21 }
  0xa5   : > { %p1480_p0 = pneg %p1479_p2  ;;  %p1486_p8 = por %p1485_p1, %p1484_p13 }
  0xa7   : > { %p1487_p9 = pnand %p1486_p8, %p1480_p0 }
  0xa9   : > { %1490 = shalt.err (!%p1487_p9)
}
  0xaa   : > { %s1491_s9 = scalar_lea.vmem %s2164_s26, 128  ;;  %s1821_s14 = smov [#allocation2]  }
  0xab   : > { %p1492_p5 = scmp.ne.s32.totalorder %s2164_s26, %s1491_s9  ;;  %s1496_s5 = sshll.u32 %s1821_s14, 4  ;;  %s1497_s5 = int_to_ptr.vmem [resolvable:$false] %s1496_s5 }
  0xac   : > { %s1498_s11 = scalar_lea.vmem %s1497_s5, 256  ;;  %p1499_p4 = scmp.lt.s32.totalorder %s2164_s26, %s1497_s5 }
  0xad   : > { %p1494_p2 = pnand %p1492_p5, %p1478_p10  ;;  %p1500_p11 = scmp.lt.s32.totalorder %s1498_s11, %s1491_s9 }
  0xaf   : > { %p1495_p3 = pneg %p1494_p2  ;;  %p1501_p12 = por %p1500_p11, %p1499_p4 }
  0xb1   : > { %p1502_p1 = pnand %p1501_p12, %p1495_p3 }
  0xb3   : > { %1505 = shalt.err (!%p1502_p1)
}
  0xb4   : > { %s2580_s20 = sld [smem:[#allocation31_spill]]  ;;  %s2581_s29 = sld [smem:[#allocation43_spill]] }
  0xb5   : > { %1233 = dma.hbm_to_vmem [thread:$0]  (!%p2170_p7), %s2162_s7, 128, %s2164_s26, %s335_s15  }
  0xb6   : > { %s1506_s14 = scalar_lea.hbm %s2181_s17, 16  ;;  %s1511_s11 = scalar_lea.hbm %s2579_s2, 64 }
  0xb7   : > { %p1507_p4 = scmp.ne.s32.totalorder %s2181_s17, %s1506_s14  ;;  %p1512_p8 = scmp.lt.u32.totalorder %s2181_s17, %s2579_s2 }
  0xb8   : > { %p1513_p7 = scmp.lt.u32.totalorder %s1511_s11, %s1506_s14  ;;  %p1515_p0 = scmp.lt.u32.totalorder %s1506_s14, %s2181_s17 }
  0xb9   : > { %p1509_p3 = pnand %p1507_p4, %p1988_p6 }
  0xba   : > { %s376_s28 = scalar_lea.vmem [#allocation7], %s2580_s20  ;;  %s2213_s9 = scalar_lea.hbm %s2581_s29, %s2175_s21 }
  0xbb   : > { %s383_s6 = sshll.u32 %s376_s28, 4  ;;  %p1510_p9 = pneg %p1509_p3  ;;  %s384_s6 = int_to_ptr.vmem [resolvable:$true] %s383_s6 }
  0xbc   : > { %p1514_p10 = por %p1513_p7, %p1512_p8 }
  0xbe   : > { %p1516_p13 = por %p1515_p0, %p1514_p10 }
  0xc0   : > { %p1517_p5 = pnand %p1516_p13, %p1510_p9 }
  0xc2   : > { %1520 = shalt.err (!%p1517_p5)
}
  0xc3   : > { %s1521_s26 = scalar_lea.vmem %s384_s6, 16  ;;  %s1822_s7 = smov [#allocation7]  }
  0xc4   : > { %p1522_p2 = scmp.ne.s32.totalorder %s384_s6, %s1521_s26  ;;  %s1526_s15 = sshll.u32 %s1822_s7, 4  ;;  %s1527_s15 = int_to_ptr.vmem [resolvable:$false] %s1526_s15 }
  0xc5   : > { %s1528_s28 = scalar_lea.vmem %s1527_s15, 32  ;;  %p1529_p1 = scmp.lt.s32.totalorder %s384_s6, %s1527_s15 }
  0xc6   : > { %p1524_p11 = pnand %p1522_p2, %p1988_p6  ;;  %p1530_p4 = scmp.lt.s32.totalorder %s1528_s28, %s1521_s26 }
  0xc8   : > { %p1525_p12 = pneg %p1524_p11  ;;  %p1531_p3 = por %p1530_p4, %p1529_p1 }
  0xca   : > { %p1532_p7 = pnand %p1531_p3, %p1525_p12 }
  0xcc   : > { %1535 = shalt.err (!%p1532_p7)
}
  0xcd   : > { %p2582_p8 = scmp.ne.s32.totalorder %s2553_s8, 0  ;;  %s2583_s0 = scalar_lea.sflag [#allocation6], %s1957_s23 }
  0xce   : > { %s414_s1 = scalar_lea.vmem [#allocation10], %s2580_s20  ;;  %s2584_s4 = sld [smem:[#allocation45_spill]] }
  0xcf   : > { %1239 = dma.hbm_to_vmem [thread:$0]  (!%p2582_p8), %s2181_s17, 16, %s384_s6, %s2583_s0  }
  0xd0   : > { %s421_s18 = sshll.u32 %s414_s1, 4  ;;  %s1536_s11 = scalar_lea.hbm %s2213_s9, 16  ;;  %s422_s18 = int_to_ptr.vmem [resolvable:$true] %s421_s18 }
  0xd1   : > { %p1537_p9 = scmp.ne.s32.totalorder %s2213_s9, %s1536_s11  ;;  %s1541_s15 = scalar_lea.hbm %s2581_s29, 64 }
  0xd2   : > { %p1542_p13 = scmp.lt.u32.totalorder %s2213_s9, %s2581_s29  ;;  %p1543_p5 = scmp.lt.u32.totalorder %s1541_s15, %s1536_s11 }
  0xd3   : > { %p1539_p10 = pnand %p1537_p9, %p1988_p6  ;;  %p1545_p11 = scmp.lt.u32.totalorder %s1536_s11, %s2213_s9 }
  0xd4   : > { %s2239_s5 = scalar_lea.hbm %s2584_s4, %s2175_s21  ;;  %p1544_p2 = por %p1543_p5, %p1542_p13 }
  0xd5   : > { %p1540_p0 = pneg %p1539_p10 }
  0xd6   : > { %p1546_p12 = por %p1545_p11, %p1544_p2 }
  0xd8   : > { %p1547_p1 = pnand %p1546_p12, %p1540_p0 }
  0xda   : > { %1550 = shalt.err (!%p1547_p1)
}
  0xdb   : > { %s1551_s17 = scalar_lea.vmem %s422_s18, 16  ;;  %s1823_s21 = smov [#allocation10]  }
  0xdc   : > { %p1552_p4 = scmp.ne.s32.totalorder %s422_s18, %s1551_s17  ;;  %s1556_s6 = sshll.u32 %s1823_s21, 4  ;;  %s1557_s6 = int_to_ptr.vmem [resolvable:$false] %s1556_s6 }
  0xdd   : > { %s1558_s0 = scalar_lea.vmem %s1557_s6, 32  ;;  %p1559_p9 = scmp.lt.s32.totalorder %s422_s18, %s1557_s6 }
  0xde   : > { %p1554_p3 = pnand %p1552_p4, %p1988_p6  ;;  %p1560_p10 = scmp.lt.s32.totalorder %s1558_s0, %s1551_s17 }
  0xe0   : > { %p1555_p7 = pneg %p1554_p3  ;;  %p1561_p8 = por %p1560_p10, %p1559_p9 }
  0xe2   : > { %p1562_p5 = pnand %p1561_p8, %p1555_p7 }
  0xe4   : > { %1565 = shalt.err (!%p1562_p5)
}
  0xe5   : > { %p2585_p13 = scmp.ne.s32.totalorder %s2553_s8, 0  ;;  %s2586_s2 = scalar_lea.sflag [#allocation9], %s1957_s23 }
  0xe6   : > { %s452_s1 = scalar_lea.vmem [#allocation13], %s2580_s20  ;;  %s1566_s14 = scalar_lea.hbm %s2239_s5, 16 }
  0xe7   : > { %1245 = dma.hbm_to_vmem [thread:$0]  (!%p2585_p13), %s2213_s9, 16, %s422_s18, %s2586_s2  }
  0xe8   : > { %s459_s12 = sshll.u32 %s452_s1, 4  ;;  %p1567_p0 = scmp.ne.s32.totalorder %s2239_s5, %s1566_s14  ;;  %s460_s12 = int_to_ptr.vmem [resolvable:$true] %s459_s12 }
  0xe9   : > { %s1571_s7 = scalar_lea.hbm %s2584_s4, 64  ;;  %p1572_p11 = scmp.lt.u32.totalorder %s2239_s5, %s2584_s4 }
  0xea   : > { %p1569_p8 = pnand %p1567_p0, %p1988_p6  ;;  %p1573_p12 = scmp.lt.u32.totalorder %s1571_s7, %s1566_s14 }
  0xeb   : > { %p1575_p4 = scmp.lt.u32.totalorder %s1566_s14, %s2239_s5 }
  0xec   : > { %p1570_p2 = pneg %p1569_p8  ;;  %p1574_p1 = por %p1573_p12, %p1572_p11 }
  0xee   : > { %p1576_p3 = por %p1575_p4, %p1574_p1 }
  0xf0   : > { %p1577_p7 = pnand %p1576_p3, %p1570_p2 }
  0xf2   : > { %1580 = shalt.err (!%p1577_p7)
}
  0xf3   : > { %s1581_s20 = scalar_lea.vmem %s460_s12, 16  ;;  %s1824_s9 = smov [#allocation13]  }
  0xf4   : > { %p1582_p9 = scmp.ne.s32.totalorder %s460_s12, %s1581_s20  ;;  %s1586_s18 = sshll.u32 %s1824_s9, 4  ;;  %s1587_s18 = int_to_ptr.vmem [resolvable:$false] %s1586_s18 }
  0xf5   : > { %s1588_s17 = scalar_lea.vmem %s1587_s18, 32  ;;  %p1589_p0 = scmp.lt.s32.totalorder %s460_s12, %s1587_s18 }
  0xf6   : > { %p1584_p10 = pnand %p1582_p9, %p1988_p6  ;;  %p1590_p8 = scmp.lt.s32.totalorder %s1588_s17, %s1581_s20 }
  0xf8   : > { %p1585_p5 = pneg %p1584_p10  ;;  %p1591_p13 = por %p1590_p8, %p1589_p0 }
  0xfa   : > { %p1592_p11 = pnand %p1591_p13, %p1585_p5 }
  0xfc   : > { %1595 = shalt.err (!%p1592_p11)
}
  0xfd   : > { %p2587_p12 = scmp.ne.s32.totalorder %s2553_s8, 0  ;;  %s2588_s21 = scalar_lea.sflag [#allocation12], %s1957_s23 }
  0xfe   : > { %s2589_s6 = sld [smem:[#allocation32_spill]] }
  0xff   : > { %1251 = dma.hbm_to_vmem [thread:$0]  (!%p2587_p12), %s2239_s5, 16, %s460_s12, %s2588_s21  }
 0x104   : > { %p2590_p2 = scmp.ne.s32.totalorder %s2589_s6, 0 }
 0x105   : > { %s470_s27 = sand.u32 (!%p2590_p2), 1, %s1790_s16   ;;  %p2591_p6 = scmp.ne.s32.totalorder (!%p2590_p2), %s2566_s19, 0 }
 0x106   : > { %468 = sbr.rel (%p2590_p2) target bundleno = 571 (0x23b), region = 48  ;;  %s2283_s0 = sshll.u32 (!%p2590_p2), %s470_s27, 3 }
 0x107   : > { %s471_s2 = scalar_lea.sflag (!%p2590_p2), [#allocation3], %s470_s27  ;;  %s474_s1 = scalar_lea.vmem (!%p2590_p2), [#allocation2], %s2283_s0 }
 0x10d   : > { %1737 = dma.done.wait (%p2591_p6), %s471_s2, 128  }
 0x10e   : > { %1739 = vsyncadd (%p2591_p6), %s471_s2, 4294967168  ;;  %s2291_s8 = sand.u32 1, %s2095_s24   ;;  %s2294_s23 = sand.u32 1, %s1778_s13  }
 0x10f   : > { %s2297_s5 = sshll.u32 %s2294_s23, 4  ;;  %s480_s12 = scalar_lea.sflag [#allocation6], %s2291_s8 }
 0x110   : > { %s483_s14 = scalar_lea.vmem [#allocation5], %s2297_s5  ;;  %p2592_p13 = scmp.ne.s32.totalorder %s2569_s3, 0 }
 0x112   : > { %1741 = dma.done.wait (%p2592_p13), %s480_s12, 272  }
 0x113   : > { %1743 = vsyncadd (%p2592_p13), %s480_s12, 4294967024  ;;  %s491_s24 = scalar_lea.vmem [#allocation7], %s2294_s23  ;;  %s497_s19 = scalar_lea.sflag [#allocation9], %s2291_s8 }
 0x114   : > { %s500_s11 = scalar_lea.vmem [#allocation8], %s2297_s5 }
 0x115   : > { %1745 = dma.done.wait (%p2592_p13), %s497_s19, 272  }
 0x116   : > { %1747 = vsyncadd (%p2592_p13), %s497_s19, 4294967024  ;;  %s508_s26 = scalar_lea.vmem [#allocation10], %s2294_s23  ;;  %s514_s7 = scalar_lea.sflag [#allocation12], %s2291_s8 }
 0x117   : > { %s517_s15 = scalar_lea.vmem [#allocation11], %s2297_s5 }
 0x118   : > { %1749 = dma.done.wait (%p2592_p13), %s514_s7, 272  }
 0x119   : > { %1751 = vsyncadd (%p2592_p13), %s514_s7, 4294967024  ;;  %v1825_v0 = vmov 0.0   ;;  %vm1826_vm0 = vmmov 0   ;;  %v1380_v1 = vld [vmem:[%s483_s14] sm:$0xff]   ;;  %v1381_v2 = vld [vmem:[%s483_s14 + $0x8] sm:$0xff]   ;;  %s2593_s3 = sld [smem:[#allocation28_spill]] }
 0x11a   : > { %1186 = vmatprep.subr.bf16.mxu0 %v1825_v0  ;;  %1194 = vmatprep.subr.bf16.mxu1 %v1825_v0  ;;  %v1382_v3 = vld [vmem:[%s500_s11] sm:$0xff]   ;;  %v1384_v6 = vld [vmem:[%s500_s11 + $0x8] sm:$0xff]   ;;  %vm623_vm1 = vcmask 261120   ;;  %s2594_s28 = sld [smem:[#allocation27_spill]]  ;;  %s580_s20 = sand.u32 1, %s1766_s10   ;;  %vm795_vm2 = vcmask 60416  }
 0x11b   : > { %1190 = vmatprep.mubr.msk.bf16.mxu0 %vm1826_vm0, %v1825_v0  ;;  %1198 = vmatprep.mubr.msk.bf16.mxu1 %vm1826_vm0, %v1825_v0  ;;  %v598_v4 = vld [vmem:[%s474_s1] sm:$0xff]  ;;  %s2330_s18 = sshll.u32 %s580_s20, 2  ;;  %s2595_s12 = sld [smem:[#allocation47_spill]] }
 0x11c   : > { %1187 = vmatpush3.bf16.msra.mxu0 %v1380_v1  ;;  %1195 = vmatpush3.bf16.msra.mxu1 %v1382_v3  ;;  %v599_v5 = vpack.c.bf16 %v598_v4, %v598_v4  ;;  %v1383_v7 = vld [vmem:[%s517_s15] sm:$0xff]   ;;  %v1385_v8 = vld [vmem:[%s517_s15 + $0x8] sm:$0xff]   ;;  %s589_s6 = scalar_lea.vmem [#allocation15], %s2330_s18  ;;  %s582_s0 = scalar_lea.vmem [#allocation14], %s2330_s18 }
 0x11d   : > { %1188 = vmatprep.subr.bf16.mxu0 %v1825_v0  ;;  %1196 = vmatprep.subr.bf16.mxu1 %v1825_v0  ;;  %v1151_v9 = vld [vmem:[%s491_s24] ss:$0 sm:$0xff]  ;;  %s842_s27 = sshll.u32 %s589_s6, 4  ;;  %s827_s2 = sshll.u32 %s582_s0, 4  ;;  %s2345_s27 = int_to_ptr.vmem [resolvable:$true] %s842_s27  ;;  %s2354_s2 = int_to_ptr.vmem [resolvable:$true] %s827_s2 }
 0x11e   : > { %v1155_v11 = vld [vmem:[%s508_s26] ss:$0 sm:$0xff]  ;;  %s525_s19 = scalar_lea.vmem [#allocation13], %s2294_s23  ;;  %s2597_s7 = sld [smem:[#allocation46_spill]] }
 0x11f   : > { %s1166_s9 = sshll.u32 %s2593_s3, 2  ;;  %v1159_v24 = vld [vmem:[%s525_s19] ss:$0 sm:$0xff]  ;;  %s596_s3 = scalar_lea.vmem [#allocation17], %s2330_s18 }
 0x120   : > { %1189 = vmatpush3.bf16.msra.mxu0 %v1381_v2  ;;  %1197 = vmatpush3.bf16.msra.mxu1 %v1384_v6  ;;  %s823_s17 = sadd.s32 %s2594_s28, %s1166_s9  ;;  %s2361_s28 = sshll.u32 %s596_s3, 4  ;;  %s858_s28 = int_to_ptr.vmem [resolvable:$true] %s2361_s28 }
 0x121   : > { %1202 = vmatprep.subr.bf16.mxu0 %v1825_v0  ;;  %s2335_s21 = sshll.u32 %s823_s17, 6  ;;  %s2596_s24 = smov %s2595_s12 }
 0x122   : > { %s2343_s14 = scalar_lea.hbm %s2595_s12, %s2335_s21  ;;  %s807_s9 = scalar_lea.sflag [#allocation16], %s2291_s8 }
 0x123   : > { %1191 = vmatmul.mubr.msk.bf16.vlgmr.msra.gmra.mrb[0].mxu0 %vm623_vm1, %v599_v5  ;;  %1199 = vmatmul.mubr.msk.bf16.vlgmr.msra.gmra.mrb[0].mxu1 %vm623_vm1, %v599_v5  ;;  %s1596_s23 = scalar_lea.vmem %s2345_s27, 64  ;;  %p2598_p4 = scmp.ne.s32.totalorder %s2572_s25, 0 }
 0x124   : > { %1203 = vmatpush3.bf16.msra.mxu0 %v1383_v7  ;;  %1206 = vmatprep.mubr.msk.bf16.mxu0 %vm1826_vm0, %v1825_v0  ;;  %s2352_s15 = scalar_lea.hbm %s2597_s7, %s2335_s21  ;;  %p1597_p1 = scmp.ne.s32.totalorder %s2345_s27, %s1596_s23 }
 0x125   : > { %1204 = vmatprep.subr.bf16.mxu0 %v1825_v0  ;;  %s1827_s17 = smov [#allocation15]  }
 0x126   : > { %p1598_p3 = pnand %p1597_p1, %p2598_p4  ;;  %s1600_s1 = sshll.u32 %s1827_s17, 4  ;;  %s1601_s1 = int_to_ptr.vmem [resolvable:$false] %s1600_s1 }
 0x127   : > { %s1602_s5 = scalar_lea.vmem %s1601_s1, 128  ;;  %p1603_p9 = scmp.lt.s32.totalorder %s2345_s27, %s1601_s1 }
 0x128   : > { %1205 = vmatpush3.bf16.msra.mxu0 %v1385_v8  ;;  %p1599_p7 = pneg %p1598_p3  ;;  %p1604_p10 = scmp.lt.s32.totalorder %s1602_s5, %s1596_s23 }
 0x12a   : > { %p1605_p5 = por %p1604_p10, %p1603_p9 }
 0x12b   : > { %1207 = vmatmul.mubr.msk.bf16.vlgmr.msra.gmra.mrb[4].mxu0 %vm623_vm1, %v599_v5 }
 0x12c   : > { %p1606_p0 = pnand %p1605_p5, %p1599_p7 }
 0x1f6   : > { %v661_v10 = vpop.f32.mrb[0].mxu0  ;;  %v724_v15 = vpop.f32.mrb[0].mxu1 }
 0x1f7   : > { %v662_v12 = vadd.f32 %v1151_v9, %v661_v10  ;;  %v1192_v13 = vpop.f32.mrb[1].mxu0  ;;  %v725_v18 = vadd.f32 %v1155_v11, %v724_v15  ;;  %v1200_v19 = vpop.f32.mrb[1].mxu1 }
 0x1f8   : > { %v664_v14 = vpop.f32.mrb[2].mxu0  ;;  %v727_v20 = vpop.f32.mrb[2].mxu1 }
 0x1f9   : > { %v793_v16 = vmul.f32 0.35355338, %v662_v12  ;;  %v1193_v17 = vpop.f32.mrb[3].mxu0  ;;  %v797_v22 = vpack.c.bf16 %v725_v18, %v725_v18  ;;  %v1201_v23 = vpop.f32.mrb[3].mxu1 }
 0x1fb   : > { %v794_v21 = vpack.c.bf16 %v793_v16, %v793_v16  ;;  %798 = vst.msk [vmem:[%s589_s6] sm:$0xf] %vm795_vm2, %v797_v22 }
 0x1fd   : > { %796 = vst.msk [vmem:[%s582_s0] sm:$0xf] %vm795_vm2, %v794_v21 }
 0x1fe   : > { %v787_v25 = vpop.f32.mrb[4].mxu0 }
 0x1ff   : > { %1609 = shalt.err (!%p1606_p0)
}
 0x200   : > { %s1610_s6 = scalar_lea.hbm %s2343_s14, 64  ;;  %s1614_s19 = scalar_lea.hbm %s2596_s24, 512 }
 0x201   : > { %p1611_p8 = scmp.ne.s32.totalorder %s2343_s14, %s1610_s6  ;;  %p1615_p2 = scmp.lt.u32.totalorder %s2343_s14, %s2596_s24 }
 0x202   : > { %p1616_p6 = scmp.lt.u32.totalorder %s1614_s19, %s1610_s6  ;;  %p1618_p1 = scmp.lt.u32.totalorder %s1610_s6, %s2343_s14 }
 0x203   : > { %p1612_p11 = pnand %p1611_p8, %p2598_p4 }
 0x204   : > { %p1617_p13 = por %p1616_p6, %p1615_p2 }
 0x205   : > { %p1613_p12 = pneg %p1612_p11 }
 0x206   : > { %p1619_p3 = por %p1618_p1, %p1617_p13 }
 0x208   : > { %p1620_p7 = pnand %p1619_p3, %p1613_p12 }
 0x20a   : > { %1623 = shalt.err (!%p1620_p7)
}
 0x20b   : > { %1225 = dma.vmem_to_hbm [thread:$0]  (%p2598_p4), %s2345_s27, 64, %s2343_s14, %s807_s9   ;;  %v788_v26 = vadd.f32 %v1159_v24, %v787_v25  ;;  %v1208_v27 = vpop.f32.mrb[5].mxu0 }
 0x20c   : > { %s802_s23 = scalar_lea.sflag [#allocation4], %s580_s20  ;;  %s1624_s17 = scalar_lea.vmem %s2354_s2, 64 }
 0x20d   : > { %p1625_p9 = scmp.ne.s32.totalorder %s2354_s2, %s1624_s17  ;;  %s1828_s1 = smov [#allocation14]  }
 0x20e   : > { %s1628_s5 = sshll.u32 %s1828_s1, 4  ;;  %s1629_s5 = int_to_ptr.vmem [resolvable:$false] %s1628_s5 }
 0x20f   : > { %p1626_p10 = pnand %p1625_p9, %p2598_p4  ;;  %s1630_s6 = scalar_lea.vmem %s1629_s5, 128 }
 0x210   : > { %p1631_p0 = scmp.lt.s32.totalorder %s2354_s2, %s1629_s5  ;;  %p1632_p8 = scmp.lt.s32.totalorder %s1630_s6, %s1624_s17 }
 0x211   : > { %p1627_p5 = pneg %p1626_p10 }
 0x212   : > { %p1633_p11 = por %p1632_p8, %p1631_p0 }
 0x214   : > { %p1634_p12 = pnand %p1633_p11, %p1627_p5 }
 0x216   : > { %1637 = shalt.err (!%p1634_p12)
}
 0x217   : > { %s1638_s20 = scalar_lea.hbm %s2352_s15, 64  ;;  %s1642_s0 = scalar_lea.hbm %s2597_s7, 512 }
 0x218   : > { %p1639_p2 = scmp.ne.s32.totalorder %s2352_s15, %s1638_s20  ;;  %p1643_p1 = scmp.lt.u32.totalorder %s2352_s15, %s2597_s7 }
 0x219   : > { %p1644_p3 = scmp.lt.u32.totalorder %s1642_s0, %s1638_s20  ;;  %p1646_p9 = scmp.lt.u32.totalorder %s1638_s20, %s2352_s15 }
 0x21a   : > { %p1640_p6 = pnand %p1639_p2, %p2598_p4 }
 0x21b   : > { %p1645_p7 = por %p1644_p3, %p1643_p1 }
 0x21c   : > { %p1641_p13 = pneg %p1640_p6 }
 0x21d   : > { %p1647_p10 = por %p1646_p9, %p1645_p7 }
 0x21f   : > { %p1648_p5 = pnand %p1647_p10, %p1641_p13 }
 0x221   : > { %1651 = shalt.err (!%p1648_p5)
}
 0x222   : > { %1224 = dma.vmem_to_hbm [thread:$0]  (%p2598_p4), %s2354_s2, 64, %s2352_s15, %s802_s23   ;;  %v790_v28 = vpop.f32.mrb[6].mxu0  ;;  %v799_v29 = vpack.c.bf16 %v788_v26, %v788_v26 }
 0x223   : > { %v1209_v30 = vpop.f32.mrb[7].mxu0  ;;  %s2599_s17 = sld [smem:[#allocation48_spill]]  ;;  %s1652_s6 = scalar_lea.vmem %s858_s28, 64 }
 0x224   : > { %800 = vst.msk [vmem:[%s596_s3] sm:$0xf] %vm795_vm2, %v799_v29  ;;  %p1653_p0 = scmp.ne.s32.totalorder %s858_s28, %s1652_s6  ;;  %s1829_s20 = smov [#allocation17]  }
 0x225   : > { %s1656_s27 = sshll.u32 %s1829_s20, 4  ;;  %s1657_s27 = int_to_ptr.vmem [resolvable:$false] %s1656_s27 }
 0x226   : > { %p1654_p8 = pnand %p1653_p0, %p2598_p4  ;;  %s1658_s2 = scalar_lea.vmem %s1657_s27, 128 }
 0x227   : > { %p1659_p12 = scmp.lt.s32.totalorder %s858_s28, %s1657_s27  ;;  %p1660_p2 = scmp.lt.s32.totalorder %s1658_s2, %s1652_s6 }
 0x228   : > { %p1655_p11 = pneg %p1654_p8 }
 0x229   : > { %s2600_s1 = smov %s2599_s17  ;;  %s2414_s5 = scalar_lea.hbm %s2599_s17, %s2335_s21 }
 0x22a   : > { %p1661_p6 = por %p1660_p2, %p1659_p12 }
 0x22c   : > { %p1662_p13 = pnand %p1661_p6, %p1655_p11 }
 0x22e   : > { %1665 = shalt.err (!%p1662_p13)
}
 0x22f   : > { %s1666_s18 = scalar_lea.hbm %s2414_s5, 64  ;;  %s1670_s3 = scalar_lea.hbm %s2600_s1, 512 }
 0x230   : > { %p1667_p1 = scmp.ne.s32.totalorder %s2414_s5, %s1666_s18  ;;  %p1671_p9 = scmp.lt.u32.totalorder %s2414_s5, %s2600_s1 }
 0x231   : > { %p1672_p10 = scmp.lt.u32.totalorder %s1670_s3, %s1666_s18  ;;  %p1674_p0 = scmp.lt.u32.totalorder %s1666_s18, %s2414_s5 }
 0x232   : > { %p1668_p3 = pnand %p1667_p1, %p2598_p4 }
 0x233   : > { %p1673_p5 = por %p1672_p10, %p1671_p9 }
 0x234   : > { %p1669_p7 = pneg %p1668_p3 }
 0x235   : > { %p1675_p8 = por %p1674_p0, %p1673_p5 }
 0x237   : > { %p1676_p11 = pnand %p1675_p8, %p1669_p7 }
 0x239   : > { %1679 = shalt.err (!%p1676_p11)
}
 0x23a   : > { %1226 = dma.vmem_to_hbm [thread:$0]  (%p2598_p4), %s858_s28, 64, %s2414_s5, %s807_s9  }
 0x23b PF: > { %s2601_s0 = sld [smem:[#allocation38_spill]]  ;;  %p1263_p12 = scmp.ge.s32.totalorder %s1814_s22, 2 }
 0x23c   : > { %s869_s12 = sand.u32 1, %s1762_s30  }
 0x23d   : > { %s870_s19 = scalar_lea.sflag [#allocation4], %s869_s12 }
 0x241   : > { %p2602_p2 = scmp.ne.s32.totalorder %s2601_s0, 0 }
 0x243   : > { %p1253_p6 = pnand %p1263_p12, %p2602_p2 }
 0x245   : > { %1753 = dma.done.wait (!%p1253_p6), %s870_s19, 64  }
 0x246   : > { %1755 = vsyncadd (!%p1253_p6), %s870_s19, 4294967232  ;;  %s2603_s11 = sadd.s32 4294967294, %s1814_s22  }
 0x247   : > { %s878_s26 = sand.u32 1, %s2603_s11  }
 0x248   : > { %s879_s17 = scalar_lea.sflag [#allocation16], %s878_s26 }
 0x249   : > { %1757 = dma.done.wait (!%p1253_p6), %s879_s17, 128  }
 0x24a   : > { %1759 = vsyncadd (!%p1253_p6), %s879_s17, 4294967168  ;;  %s38_s22 = sadd.s32 1, %s1814_s22   ;;  %s2605_s8 = sld [smem:[#allocation24_spill]] }
 0x24b   : > { %p2446_p4 = scmp.ge.s32.totalorder %s38_s22, 10   ;;  %s2606_s11 = sld [smem:[#allocation37_spill]] }
 0x24c   : > { %s2607_s28 = sld [smem:[#allocation25_spill]]  ;;  %s2608_s14 = sld [smem:[#allocation35_spill]] }
 0x24d   : > { %s2609_s9 = sld [smem:[#allocation26_spill]]  ;;  %s2610_s17 = sld [smem:[#allocation36_spill]] }
 0x24e   : > { %s2611_s18 = sld [smem:[#allocation29_spill]]  ;;  %s2612_s19 = sld [smem:[#allocation30_spill]] }
 0x24f   : > { %s2613_s20 = sld [smem:[#allocation33_spill]]  ;;  %s2614_s21 = sld [smem:[#allocation34_spill]] }
 0x250   : > { %s2615_s30 = smov %s1766_s10  ;;  %s2616_s10 = smov %s2605_s8 }
 0x251   : > { %s2617_s12 = smov %s1778_s13  ;;  %s2619_s15 = smov %s1790_s16 }
 0x252   : > { %s2618_s13 = smov %s2607_s28  ;;  %37 = sbr.rel (!%p2446_p4) target bundleno = 29 (0x1d), region = 197 }
 0x253   : > { %s2620_s16 = smov %s2609_s9 }
 0x259   :  { %893 = vsyncpa [#allocation3], 1 }
 0x25a   :  { %895 = vsyncpa [#allocation3 + $0x1], 1 }
 0x25b   :  { %896 = vsyncpa [#allocation6], 1 }
 0x25c   :  { %898 = vsyncpa [#allocation6 + $0x1], 1 }
 0x25d   :  { %899 = vsyncpa [#allocation9], 1 }
 0x25e   :  { %901 = vsyncpa [#allocation9 + $0x1], 1 }
 0x25f   :  { %902 = vsyncpa [#allocation12], 1 }
 0x260   :  { %904 = vsyncpa [#allocation12 + $0x1], 1 }
 0x261   :  { %905 = vsyncpa [#allocation4], 1 }
 0x262   :  { %907 = vsyncpa [#allocation4 + $0x1], 1 }
 0x263   :  { %908 = vsyncpa [#allocation16], 1 }
 0x264   :  { %910 = vsyncpa [#allocation16 + $0x1], 1 }

</bundles_post_ra>
